<compile_context>
chip_gen: v5e
topology: v5e:2x2
jax: 0.10.0
libtpu: 0.0.40
codegen_flags: <defaults>
</compile_context>

<pallas_src>
import jax
import jax.numpy as jnp
from jax.experimental import pallas as pl
from jax.experimental.pallas import tpu as pltpu

_LANES = 128
_SUBLANES = 8
_TARGET_BLOCK_BYTES = 4 * 1024 * 1024     # per input, per grid step
_VMEM_LIMIT_BYTES = 32 * 1024 * 1024      # safe scoped limit on v5e/v6e/v7x


def _ceil_to(x, m):
    return -(-x // m) * m


def _pick_batch_tile(n_rows, row_bytes, align):
    """Byte-driven batch tile: ~_TARGET_BLOCK_BYTES per input block, sublane
    aligned; if a single block would cover everything, split into two tiles
    (when possible) so the parallel grid axis can use both v7x TensorCores."""
    tb = max(align, (_TARGET_BLOCK_BYTES // row_bytes) // align * align)
    if tb >= n_rows:
        tb = n_rows
        if n_rows > 2 * align:
            half = _ceil_to(-(-n_rows // 2), align)
            if half < n_rows:
                tb = half
    return tb


def _packed_kernel(first_ref, second_ref, m_ref, b_ref, out_ref):
    # first/second: (tb, 128) -- each physical row holds k = 128/E logical rows.
    # m_ref: (128, k) block-diagonal matrix with the Linear weight folded in (f32).
    # b_ref: (1, 1) bias scalar in SMEM.  out_ref: (tb, k) f32.
    diff = jnp.abs(first_ref[...].astype(jnp.float32)
                   - second_ref[...].astype(jnp.float32))
    # Per-logical-row weighted reduction on the MXU (idle in this HBM-bound op).
    logits = jnp.dot(diff, m_ref[...], preferred_element_type=jnp.float32) + b_ref[0, 0]
    out_ref[...] = jax.nn.sigmoid(logits)


def _natural_kernel(first_ref, second_ref, w_ref, b_ref, out_ref):
    # first/second: (tb, E); w_ref: (1, E) f32 (resident); b_ref: (1,1) SMEM.
    diff = jnp.abs(first_ref[...].astype(jnp.float32)
                   - second_ref[...].astype(jnp.float32))
    logits = jnp.sum(diff * w_ref[...], axis=-1, keepdims=True) + b_ref[0, 0]
    out_ref[...] = jax.nn.sigmoid(logits)


def learned_instruction_trace_difference(first, second, weight, bias):
    """first, second: (B, E); weight: (1, E); bias: (1,). Returns (B,) float32."""
    B, E = first.shape
    assert second.shape == (B, E)

    itemsize = jnp.dtype(first.dtype).itemsize
    align = max(_SUBLANES, 32 // itemsize)          # 8 for f32, 16 for bf16

    w_f32 = jnp.asarray(weight, jnp.float32).reshape(1, E)
    bias2d = jnp.asarray(bias, jnp.float32).reshape(1, 1)

    cost = pl.CostEstimate(
        flops=4 * B * E,
        transcendentals=B,
        bytes_accessed=2 * B * E * itemsize + B * 4 + E * 4,
    )
    cparams = pltpu.CompilerParams(
        dimension_semantics=("parallel",),
        vmem_limit_bytes=_VMEM_LIMIT_BYTES,
    )

    # ---- Lane-dense fast path: pack k logical rows per 128-lane physical row.
    if E < _LANES and _LANES % E == 0 and B >= (_LANES // E) and B % (_LANES // E) == 0:
        k = _LANES // E
        n_rows = B // k
        f_p = first.reshape(n_rows, _LANES)          # free row-major view
        s_p = second.reshape(n_rows, _LANES)
        # M[j*E + e, j] = w[e]; zeros elsewhere  ->  diff_packed @ M == per-row dot.
        m = (jnp.eye(k, dtype=jnp.float32)[:, None, :]
             * w_f32.reshape(1, E, 1)).reshape(_LANES, k)

        tb = _pick_batch_tile(n_rows, _LANES * itemsize, align)
        out = pl.pallas_call(
            _packed_kernel,
            out_shape=jax.ShapeDtypeStruct((n_rows, k), jnp.float32),
            grid=(pl.cdiv(n_rows, tb),),
            in_specs=[
                pl.BlockSpec((tb, _LANES), lambda i: (i, 0)),          # first (streamed)
                pl.BlockSpec((tb, _LANES), lambda i: (i, 0)),          # second (streamed)
                pl.BlockSpec((_LANES, k), lambda i: (0, 0)),           # weight matrix (resident)
                pl.BlockSpec(memory_space=pltpu.MemorySpace.SMEM),     # bias scalar
            ],
            out_specs=pl.BlockSpec((tb, k), lambda i: (i, 0)),
            compiler_params=cparams,
            cost_estimate=cost,
        )(f_p, s_p, m, bias2d)
        return out.reshape(B)   # .squeeze() equivalent (kept 1-D even for B == 1)

    # ---- General path: natural (B, E) layout, no padding copies.
    e_padded = _ceil_to(E, _LANES)
    tb = _pick_batch_tile(B, e_padded * itemsize, align)
    out = pl.pallas_call(
        _natural_kernel,
        out_shape=jax.ShapeDtypeStruct((B, 1), jnp.float32),
        grid=(pl.cdiv(B, tb),),
        in_specs=[
            pl.BlockSpec((tb, E), lambda i: (i, 0)),               # first (streamed)
            pl.BlockSpec((tb, E), lambda i: (i, 0)),               # second (streamed)
            pl.BlockSpec((1, E), lambda i: (0, 0)),                # weight (resident, f32)
            pl.BlockSpec(memory_space=pltpu.MemorySpace.SMEM),     # bias scalar
        ],
        out_specs=pl.BlockSpec((tb, 1), lambda i: (i, 0)),
        compiler_params=cparams,
        cost_estimate=cost,
    )(first, second, w_f32, bias2d)
    return out[:, 0]


if __name__ == "__main__":
    B, E = 8, 32  # batch=8, embedding_size=32

    key = jax.random.PRNGKey(0)
    k_first, k_second, k_w, k_b = jax.random.split(key, 4)
    first = jax.random.normal(k_first, (B, E), dtype=jnp.float32)
    second = jax.random.normal(k_second, (B, E), dtype=jnp.float32)

    # Deterministic params mirroring nn.Linear(E, 1) default init (uniform +-1/sqrt(E)).
    bound = 1.0 / (E ** 0.5)
    weight = jax.random.uniform(k_w, (1, E), minval=-bound, maxval=bound, dtype=jnp.float32)
    bias = jax.random.uniform(k_b, (1,), minval=-bound, maxval=bound, dtype=jnp.float32)

    def ref_fn(f, s):
        d = jnp.abs(f.astype(jnp.float32) - s.astype(jnp.float32))
        return jax.nn.sigmoid(d @ weight.T + bias).reshape(-1)

    # 1) Lane-dense packed path (E=32 -> 4 rows per 128-lane physical row).
    out = jax.block_until_ready(
        learned_instruction_trace_difference(first, second, weight, bias))
    assert out.shape == (B,)
    assert jnp.allclose(out, ref_fn(first, second), atol=1e-5, rtol=1e-5)

    # 2) Ragged batch not divisible by 128//E -> general path with a multi-tile
    #    grid and an unpadded partial edge block.
    B2 = 19
    k1, k2 = jax.random.split(jax.random.PRNGKey(1))
    first2 = jax.random.normal(k1, (B2, E), dtype=jnp.float32)
    second2 = jax.random.normal(k2, (B2, E), dtype=jnp.float32)
    out2 = jax.block_until_ready(
        learned_instruction_trace_difference(first2, second2, weight, bias))
    assert out2.shape == (B2,)
    assert jnp.allclose(out2, ref_fn(first2, second2), atol=1e-5, rtol=1e-5)

    # 3) bf16 inputs (halves HBM traffic on this bandwidth-bound op); the kernel
    #    accumulates in f32.
    first3 = first.astype(jnp.bfloat16)
    second3 = second.astype(jnp.bfloat16)
    out3 = jax.block_until_ready(
        learned_instruction_trace_difference(first3, second3, weight, bias))
    assert out3.shape == (B,)
    assert jnp.allclose(out3, ref_fn(first3, second3), atol=1e-4, rtol=1e-4)

    print("KERNEL_OK")
</pallas_src>

<mosaic_0001>
module attributes {stable_mosaic.version = 11 : i64} {
  func.func @_packed_kernel(%arg0: i32, %arg1: memref<2x128xf32, #tpu.memory_space<vmem>>, %arg2: memref<2x128xf32, #tpu.memory_space<vmem>>, %arg3: memref<128x4xf32, #tpu.memory_space<vmem>>, %arg4: memref<1x1xf32, #tpu.memory_space<smem>>, %arg5: memref<2x4xf32, #tpu.memory_space<vmem>>) attributes {dimension_semantics = [#tpu.dimension_semantics<parallel>], iteration_bounds = array<i64: 1>, scalar_prefetch = 0 : i64, scratch_operands = 0 : i64, tpu.core_type = #tpu.core_type<tc>, window_params = [{transform_indices = @transform_0, window_bounds = array<i64: 2, 128>}, {transform_indices = @transform_1, window_bounds = array<i64: 2, 128>}, {pipeline_mode = #tpu.pipeline_mode<synchronous>, transform_indices = @transform_2, window_bounds = array<i64: 128, 4>}, {transform_indices = @transform_3, window_bounds = array<i64: 1, 1>}, {transform_indices = @transform_4, window_bounds = array<i64: 2, 4>}]} {
    %c0 = arith.constant 0 : index
    %c0_0 = arith.constant 0 : index
    %0 = vector.load %arg1[%c0, %c0_0] : memref<2x128xf32, #tpu.memory_space<vmem>>, vector<2x128xf32>
    %c0_1 = arith.constant 0 : index
    %c0_2 = arith.constant 0 : index
    %1 = vector.load %arg2[%c0_1, %c0_2] : memref<2x128xf32, #tpu.memory_space<vmem>>, vector<2x128xf32>
    %2 = arith.subf %0, %1 : vector<2x128xf32>
    %3 = math.absf %2 : vector<2x128xf32>
    %c0_3 = arith.constant 0 : index
    %c0_4 = arith.constant 0 : index
    %4 = vector.load %arg3[%c0_3, %c0_4] : memref<128x4xf32, #tpu.memory_space<vmem>>, vector<128x4xf32>
    %cst = arith.constant dense<0.000000e+00> : vector<2x4xf32>
    %5 = tpu.matmul %3, %4, %cst {dimension_numbers = #tpu.dot_dimension_numbers<[1], [0], [0], [1], [0, 0, 1, 1], [], []>} : vector<2x128xf32>, vector<128x4xf32>, vector<2x4xf32> -> vector<2x4xf32>
    %c0_5 = arith.constant 0 : index
    %c0_6 = arith.constant 0 : index
    %6 = memref.load %arg4[%c0_5, %c0_6] : memref<1x1xf32, #tpu.memory_space<smem>>
    %7 = vector.broadcast %6 : f32 to vector<2x4xf32>
    %8 = arith.addf %5, %7 : vector<2x4xf32>
    %9 = arith.negf %8 : vector<2x4xf32>
    %10 = math.exp %9 : vector<2x4xf32>
    %cst_7 = arith.constant 1.000000e+00 : f32
    %11 = vector.broadcast %cst_7 : f32 to vector<2x4xf32>
    %12 = arith.addf %11, %10 : vector<2x4xf32>
    %13 = arith.divf %11, %12 : vector<2x4xf32>
    %c0_8 = arith.constant 0 : index
    %c0_9 = arith.constant 0 : index
    %14 = vector.load %arg5[%c0_8, %c0_9] : memref<2x4xf32, #tpu.memory_space<vmem>>, vector<2x4xf32>
    tpu.vector_store %arg5[%c0_8, %c0_9], %13 {strides = array<i32>} : memref<2x4xf32, #tpu.memory_space<vmem>>, vector<2x4xf32>,
    return
  }
  func.func @transform_0(%arg0: i32) -> (i32, i32) {
    %c0_i32 = arith.constant 0 : i32
    %c0_i32_0 = arith.constant 0 : i32
    return %arg0, %c0_i32 : i32, i32
  }
  func.func @transform_1(%arg0: i32) -> (i32, i32) {
    %c0_i32 = arith.constant 0 : i32
    %c0_i32_0 = arith.constant 0 : i32
    return %arg0, %c0_i32 : i32, i32
  }
  func.func @transform_2(%arg0: i32) -> (i32, i32) {
    %c0_i32 = arith.constant 0 : i32
    %c0_i32_0 = arith.constant 0 : i32
    %c0_i32_1 = arith.constant 0 : i32
    return %c0_i32, %c0_i32_0 : i32, i32
  }
  func.func @transform_3(%arg0: i32) -> (i32, i32) {
    %c0_i32 = arith.constant 0 : i32
    %c0_i32_0 = arith.constant 0 : i32
    %c0_i32_1 = arith.constant 0 : i32
    return %c0_i32, %c0_i32_0 : i32, i32
  }
  func.func @transform_4(%arg0: i32) -> (i32, i32) {
    %c0_i32 = arith.constant 0 : i32
    %c0_i32_0 = arith.constant 0 : i32
    return %arg0, %c0_i32 : i32, i32
  }
}

</mosaic_0001>

<bundles_post_ra>
// kernel: tpu_custom_call.1
= control target key start
LH: loop header
LB: loop body
LE: loop exit
PB: predicated region body
PF: predicated region fallthrough
CT: control target
= control target key end

     0   :  { %s216_s0 = inlined_call_operand.vmem [shape: f32[2,128], index: 0, kind: input, shape index: {}]   ;;  %s217_s1 = inlined_call_operand.vmem [shape: f32[2,128], index: 1, kind: input, shape index: {}]   ;;  %s218_s2 = inlined_call_operand.vmem [shape: f32[128,4], index: 2, kind: input, shape index: {}]   ;;  %s219_s3 = inlined_call_operand.<no memory space> [shape: f32[1,1], index: 3, kind: input, shape index: {}]   ;;  %s220_s4 = inlined_call_operand.hbm [shape: f32[2,4], index: 4, kind: output, shape index: {}]  }
   0x1   :  { %v38_v0 = vld [vmem:[%s218_s2 + $0x78] sm:$0xff]  ;;  %v37_v1 = vld [vmem:[%s218_s2 + $0x70] sm:$0xff]  ;;  %v36_v2 = vld [vmem:[%s218_s2 + $0x68] sm:$0xff] }
   0x2   :  { %41 = vmatpush.msra.mxu0 %v38_v0  ;;  %v35_v3 = vld [vmem:[%s218_s2 + $0x60] sm:$0xff]  ;;  %v34_v4 = vld [vmem:[%s218_s2 + $0x58] sm:$0xff] }
   0x4   :  { %42 = vmatpush.msra.mxu0 %v37_v1 }
   0x6   :  { %43 = vmatpush.msra.mxu0 %v36_v2 }
   0x7   :  { %10 = vsyncpa [#allocation4], 0  ;;  %v33_v5 = vld [vmem:[%s218_s2 + $0x50] sm:$0xff]  ;;  %v32_v6 = vld [vmem:[%s218_s2 + $0x48] sm:$0xff]  ;;  %v40_v20 = vstv %s219_s3  ;;  %s89_s3 = sshll.u32 %s220_s4, 4  ;;  %vm80_vm3 = vcmask 25600   ;;  %s90_s3 = int_to_ptr.hbm [resolvable:$true] %s89_s3 }
   0x8   :  { %44 = vmatpush.msra.mxu0 %v35_v3  ;;  %v31_v7 = vld [vmem:[%s218_s2 + $0x40] sm:$0xff]  ;;  %v30_v8 = vld [vmem:[%s218_s2 + $0x38] sm:$0xff]  ;;  %v29_v9 = vld [vmem:[%s218_s2 + $0x30] sm:$0xff] }
   0x9   :  { %v28_v10 = vld [vmem:[%s218_s2 + $0x28] sm:$0xff]  ;;  %v27_v11 = vld [vmem:[%s218_s2 + $0x20] sm:$0xff]  ;;  %v26_v14 = vld [vmem:[%s218_s2 + $0x18] sm:$0xff] }
   0xa   :  { %45 = vmatpush.msra.mxu0 %v34_v4  ;;  %v19_v12 = vld [vmem:[%s216_s0] sm:$0x3]  ;;  %v25_v15 = vld [vmem:[%s218_s2 + $0x10] sm:$0xff]  ;;  %v24_v17 = vld [vmem:[%s218_s2 + $0x8] sm:$0xff] }
   0xb   :  { %v20_v13 = vld [vmem:[%s217_s1] sm:$0x3] }
   0xc   :  { %46 = vmatpush.msra.mxu0 %v33_v5  ;;  %v21_v16 = vsub.f32 %v19_v12, %v20_v13  ;;  %v23_v18 = vld [vmem:[%s218_s2] sm:$0xff]  ;;  %s130_s2 = smov [#allocation3]  }
   0xd   :  { %s87_s25 = sshll.u32 %s130_s2, 4  ;;  %s88_s25 = int_to_ptr.vmem [resolvable:$true] %s87_s25 }
   0xe   :  { %47 = vmatpush.msra.mxu0 %v32_v6  ;;  %v22_v19 = vand.u32 2147483647, %v21_v16 }
  0x10   :  { %48 = vmatpush.msra.mxu0 %v31_v7 }
  0x12   :  { %49 = vmatpush.msra.mxu0 %v30_v8 }
  0x14   :  { %50 = vmatpush.msra.mxu0 %v29_v9 }
  0x16   :  { %51 = vmatpush.msra.mxu0 %v28_v10 }
  0x18   :  { %52 = vmatpush.msra.mxu0 %v27_v11 }
  0x1a   :  { %53 = vmatpush.msra.mxu0 %v26_v14 }
  0x1c   :  { %54 = vmatpush.msra.mxu0 %v25_v15 }
  0x1e   :  { %55 = vmatpush.msra.mxu0 %v24_v17 }
  0x20   :  { %56 = vmatpush.msra.mxu0 %v23_v18 }
  0x21   :  { %57 = vmatmul.f32.vlgmr.msra.gmra.mxu0 %v22_v19 }
  0x9e   :  { %v58_v21 = vpop.f32.mrf.mxu0 }
  0x9f   :  { %v59_v22 = vadd.f32 %v58_v21, %v40_v20 }
  0xa1   :  { %v98_v23 = vmul.f32 -1.442695, %v59_v22 }
  0xa3   :  { %100 = vpow2.f32 %v98_v23 }
  0xa9   :  { %v101_v24 = vpop.eup %100 }
  0xaa   :  { %v64_v25 = vadd.f32 1.0, %v101_v24 }
  0xac   :  { %102 = vrcp.f32 %v64_v25  ;;  %v76_v29 = vand.u32 2147483648, %v64_v25  ;;  %v74_v31 = vand.u32 2147483647, %v64_v25  ;;  %vm70_vm1 = vweird.f32 %v64_v25 }
  0xae   :  { %v77_v33 = vor.u32 1.1754944e-38, %v76_v29  ;;  %vm75_vm4 = vcmp.eq.f32.partialorder %v74_v31, 8.507059e+37 }
  0xb2   :  { %v103_v26 = vpop.eup %102 }
  0xb3   :  { %v66_v27 = vmul.f32 %v103_v26, %v64_v25  ;;  %vm71_vm0 = vweird.f32 %v103_v26 }
  0xb4   :  { %vm72_vm2 = vmor %vm70_vm1, %vm71_vm0 }
  0xb5   :  { %v67_v28 = vsub.f32 1.0, %v66_v27 }
  0xb7   :  { %v68_v30 = vmul.f32 %v103_v26, %v67_v28 }
  0xb9   :  { %v69_v32 = vadd.f32 %v103_v26, %v68_v30 }
  0xbb   :  { %v73_v34 = vsel %vm72_vm2, %v103_v26, %v69_v32 }
  0xbc   :  { %v78_v35 = vsel %vm75_vm4, %v77_v33, %v73_v34 }
  0xbd   :  { %81 = vst.msk [vmem:[#allocation3] sm:$0x3] %vm80_vm3, %v78_v35 }
  0xbe   :  { %92 = dma.vmem_to_hbm [thread:$0]  %s88_s25, 32, %s90_s3, [#allocation4]  }
  0xbf   :  { %128 = dma.done.wait [#allocation4], 32  }
  0xc0   :  { %129 = vsyncadd [#allocation4], 4294967264 }
  0xc1   :  { %97 = vsyncpa [#allocation4], 1 }

</bundles_post_ra>
